<compile_context>
chip_gen: v6e
topology: v6e:2x2x1
jax: 0.10.0
libtpu: 0.0.40
codegen_flags: <defaults>
</compile_context>

<pallas_src>
import functools

import jax
import jax.numpy as jnp
import numpy as np
from jax.experimental import pallas as pl
from jax.experimental.pallas import tpu as pltpu


# ---------------------------------------------------------------------------
# Model configuration (small, synthetic)
# ---------------------------------------------------------------------------
VOCAB_SIZE = 50
EMBED_DIM = 32          # E
KERNEL_NUM = 8          # C  (filters per conv)
KERNEL_SIZES = (3, 4, 5)
N_CLASS = 4
SEQ_LEN = 16            # L
BATCH = 2               # B

KMIN = min(KERNEL_SIZES)
KMAX = max(KERNEL_SIZES)
C3 = len(KERNEL_SIZES) * KERNEL_NUM          # 3C = 24


def _round_up(x, m):
    return (x + m - 1) // m * m


T_VALID = SEQ_LEN - KMIN + 1                 # valid output positions of k=KMIN
T_PAD = _round_up(T_VALID, 8)                # padded so (B, Tp, 3C) reshape is
                                             # sublane-aligned (16 here)

# Static row offsets inside the packed parameter slab (all sublane-aligned or
# within the first tile).
ROW_BCONV = 0                                # (1, 3C)   conv bias
ROW_FCB = 1                                  # (1, NC)   fc bias
ROW_FCW = 8                                  # (3C, NC)  fc weight
ROW_MASK = _round_up(ROW_FCW + C3, 8)        # (B*Tp, 3C) max-pool validity mask
SLAB_ROWS = _round_up(ROW_MASK + BATCH * T_PAD, 8)
SLAB_COLS = 128


# ---------------------------------------------------------------------------
# Pallas kernel: (embed+conv fused matmul) -> relu -> masked max-pool -> fc
#                -> log_softmax
# ---------------------------------------------------------------------------
def textcnn_kernel(ids_ref, wfold_ref, slab_ref, out_ref, *,
                   batch, t_pad, row_bconv, row_fcb, row_fcw, row_mask):
    # ids_ref   : (B*Tp, KMAX) int32   im2col'ed token ids, -1 = sentinel pad
    # wfold_ref : (KMAX, V, 3C) f32    per-tap (embedding @ conv-weight) tables
    # slab_ref  : (SLAB_ROWS, 128) f32 packed {conv bias, fc bias, fc W, mask}
    # out_ref   : (B, n_class) f32
    B, Tp = batch, t_pad
    BT, KTAPS = ids_ref.shape
    _, V, c3 = wfold_ref.shape
    NC = out_ref.shape[1]

    v_iota = jax.lax.broadcasted_iota(jnp.int32, (BT, V), 1)

    # Fused embedding-gather + conv: per tap, an exact one-hot row-select matmul
    # against the pre-folded (V, 3C) table, accumulated in one f32 buffer.
    # Sentinel id -1 matches nothing -> padded rows contribute zero.
    acc = None
    for j in range(KTAPS):
        onehot = (v_iota == ids_ref[:, j:j + 1]).astype(jnp.float32)   # (BT, V)
        part = jnp.dot(onehot, wfold_ref[j],
                       preferred_element_type=jnp.float32)             # (BT, 3C)
        acc = part if acc is None else acc + part

    # Bias + ReLU once on the whole batched activation, then zero-mask the
    # invalid tail positions (exact: post-ReLU values are >= 0).
    bconv = slab_ref[row_bconv:row_bconv + 1, 0:c3]                    # (1, 3C)
    mask = slab_ref[row_mask:row_mask + BT, 0:c3]                      # (BT, 3C)
    act = jnp.maximum(acc + bconv, 0.0) * mask

    # Single per-batch max-pool (Tp is a multiple of 8 -> aligned regroup).
    feats = jnp.max(act.reshape(B, Tp, c3), axis=1)                    # (B, 3C)

    # nn.Dropout -> identity at inference.  FC + stable log_softmax.
    fcw = slab_ref[row_fcw:row_fcw + c3, 0:NC]                         # (3C, NC)
    fcb = slab_ref[row_fcb:row_fcb + 1, 0:NC]                          # (1, NC)
    logits = jnp.dot(feats, fcw, preferred_element_type=jnp.float32) + fcb
    m = jnp.max(logits, axis=1, keepdims=True)
    shifted = logits - m
    lse = jnp.log(jnp.sum(jnp.exp(shifted), axis=1, keepdims=True))
    out_ref[...] = shifted - lse


# ---------------------------------------------------------------------------
# Wrapper
# ---------------------------------------------------------------------------
@jax.jit
def textcnn_forward(token_ids, wfold, slab):
    """token_ids: (B, L) int.  wfold/slab from prepare_params (host prep)."""
    B, L = token_ids.shape
    # Wrapper-side id-level im2col with -1 sentinel padding (tiny int plumbing;
    # the one-hot compare against -1 matches nothing inside the kernel).
    pad_cols = (KMAX - 1) + (T_PAD - T_VALID)
    ids_pad = jnp.concatenate(
        [token_ids.astype(jnp.int32),
         jnp.full((B, pad_cols), -1, jnp.int32)], axis=1)              # (B, L+pad)
    cols = [ids_pad[:, j:j + T_PAD] for j in range(KMAX)]              # (B, Tp) each
    ids_im2col = jnp.stack(cols, axis=-1).reshape(B * T_PAD, KMAX)     # (B*Tp, KMAX)

    vmem = pl.BlockSpec(memory_space=pltpu.MemorySpace.VMEM)
    kernel = functools.partial(
        textcnn_kernel, batch=B, t_pad=T_PAD,
        row_bconv=ROW_BCONV, row_fcb=ROW_FCB, row_fcw=ROW_FCW, row_mask=ROW_MASK)
    return pl.pallas_call(
        kernel,
        out_shape=jax.ShapeDtypeStruct((B, N_CLASS), jnp.float32),
        in_specs=[vmem, vmem, vmem],
        out_specs=vmem,
    )(ids_im2col, wfold, slab)


def prepare_params(embed_table, conv_ws, conv_bs, fc_w, fc_b):
    """Host-side, one-time prep (outside the hot path).

    Returns:
      wfold: (KMAX, V, 3C)  embedding folded into the tap-padded conv weights
      slab : (SLAB_ROWS, 128) packed {conv bias, fc bias, fc weight, pool mask}
    """
    E = embed_table.shape[1]
    C = KERNEL_NUM

    # Zero-pad each branch to KMAX taps, concat on channel axis -> (KMAX, E, 3C),
    # then fold in the embedding table (exact linear refactor of gather+conv).
    w_all = jnp.zeros((KMAX, E, C3), jnp.float32)
    for bi, w in enumerate(conv_ws):
        k = w.shape[0]
        w_all = w_all.at[:k, :, bi * C:(bi + 1) * C].set(w)
    wfold = jnp.einsum('ve,kec->kvc', embed_table, w_all)              # (KMAX, V, 3C)

    # Validity mask for the max-pool: branch with kernel k is valid for
    # t < L - k + 1; padded rows t >= T_VALID are invalid for every branch.
    mask_t = np.zeros((T_PAD, C3), np.float32)
    for bi, k in enumerate(KERNEL_SIZES):
        mask_t[:SEQ_LEN - k + 1, bi * C:(bi + 1) * C] = 1.0
    mask = np.tile(mask_t, (BATCH, 1))                                 # (B*Tp, 3C)

    # Single (8,128)-aligned parameter slab.
    slab = np.zeros((SLAB_ROWS, SLAB_COLS), np.float32)
    slab[ROW_BCONV, :C3] = np.concatenate([np.asarray(b)[0] for b in conv_bs])
    slab[ROW_FCB, :N_CLASS] = np.asarray(fc_b)[0]
    slab[ROW_FCW:ROW_FCW + C3, :N_CLASS] = np.asarray(fc_w)
    slab[ROW_MASK:ROW_MASK + BATCH * T_PAD, :C3] = mask
    return wfold, jnp.asarray(slab)


# ---------------------------------------------------------------------------
# Pure-JAX reference (faithful to the PyTorch module, uses UNFUSED weights)
# ---------------------------------------------------------------------------
def textcnn_reference(token_ids, embed_table, conv_ws, conv_bs, fc_w, fc_b):
    emb = jnp.take(embed_table, token_ids.astype(jnp.int32), axis=0)   # (B, L, E)
    B, L, _ = emb.shape
    feats = []
    for w, bb in zip(conv_ws, conv_bs):
        k = w.shape[0]
        out_len = L - k + 1
        acc = jnp.zeros((B, out_len, w.shape[-1]), jnp.float32)
        for j in range(k):
            acc = acc + jnp.einsum('ble,ec->blc', emb[:, j:j + out_len, :], w[j])
        act = jax.nn.relu(acc + bb[None, :, :])
        feats.append(jnp.max(act, axis=1))
    f = jnp.concatenate(feats, axis=1)
    logits = f @ fc_w + fc_b
    return jax.nn.log_softmax(logits, axis=1)


# ---------------------------------------------------------------------------
# Main
# ---------------------------------------------------------------------------
if __name__ == "__main__":
    key = jax.random.PRNGKey(0)
    keys = jax.random.split(key, 10)

    # pretrained_embed: (vocab_size, embedding_dim)
    embed_table = jax.random.normal(keys[0], (VOCAB_SIZE, EMBED_DIM),
                                    jnp.float32) * 0.1

    def conv_params(kw, kb, k):
        # PyTorch Conv2d weight (C, 1, k, E) -> stored as (k, E, C)
        w = jax.random.normal(kw, (KERNEL_NUM, 1, k, EMBED_DIM),
                              jnp.float32) * 0.1
        w = jnp.transpose(w[:, 0, :, :], (1, 2, 0))          # (k, E, C)
        b = jax.random.normal(kb, (1, KERNEL_NUM), jnp.float32) * 0.1
        return w, b

    w1, b1 = conv_params(keys[1], keys[2], KERNEL_SIZES[0])
    w2, b2 = conv_params(keys[3], keys[4], KERNEL_SIZES[1])
    w3, b3 = conv_params(keys[5], keys[6], KERNEL_SIZES[2])

    # PyTorch Linear weight (n_class, 3C) -> stored transposed (3C, n_class)
    fc_w = jax.random.normal(keys[7], (C3, N_CLASS), jnp.float32) * 0.1
    fc_b = jax.random.normal(keys[8], (1, N_CLASS), jnp.float32) * 0.1

    # Host-side fused operands (not in the hot path).
    wfold, slab = prepare_params(embed_table, (w1, w2, w3), (b1, b2, b3),
                                 fc_w, fc_b)

    # Input token ids (B, L)
    token_ids = jax.random.randint(keys[9], (BATCH, SEQ_LEN), 0, VOCAB_SIZE,
                                   dtype=jnp.int32)

    out = textcnn_forward(token_ids, wfold, slab)
    out = jax.block_until_ready(out)

    ref = textcnn_reference(token_ids, embed_table, (w1, w2, w3), (b1, b2, b3),
                            fc_w, fc_b)
    ref = jax.block_until_ready(ref)

    # f32 end-to-end; small slack for the different (folded) contraction order.
    np.testing.assert_allclose(np.asarray(out), np.asarray(ref),
                               rtol=1e-4, atol=1e-5)
    print("KERNEL_OK")
</pallas_src>

<mosaic_0001>
module attributes {stable_mosaic.version = 11 : i64} {
  func.func @textcnn_kernel(%arg0: memref<32x5xi32, #tpu.memory_space<vmem>>, %arg1: memref<5x50x24xf32, #tpu.memory_space<vmem>>, %arg2: memref<64x128xf32, #tpu.memory_space<vmem>>, %arg3: memref<2x4xf32, #tpu.memory_space<vmem>>) attributes {dimension_semantics = [], scalar_prefetch = 0 : i64, scratch_operands = 0 : i64, tpu.core_type = #tpu.core_type<tc>} {
    %0 = tpu.iota {dimensions = array<i32: 1>} : vector<32x50xi32>
    %c0 = arith.constant 0 : index
    %c0_0 = arith.constant 0 : index
    %1 = vector.load %arg0[%c0, %c0_0] : memref<32x5xi32, #tpu.memory_space<vmem>>, vector<32x1xi32>
    %2 = vector.broadcast %1 : vector<32x1xi32> to vector<32x50xi32>
    %3 = arith.cmpi eq, %0, %2 : vector<32x50xi32>
    %4 = arith.extui %3 : vector<32x50xi1> to vector<32x50xi32>
    %5 = arith.sitofp %4 : vector<32x50xi32> to vector<32x50xf32>
    %c0_1 = arith.constant 0 : index
    %c0_2 = arith.constant 0 : index
    %c0_3 = arith.constant 0 : index
    %6 = vector.load %arg1[%c0_1, %c0_2, %c0_3] : memref<5x50x24xf32, #tpu.memory_space<vmem>>, vector<1x50x24xf32>
    %7 = vector.shape_cast %6 : vector<1x50x24xf32> to vector<50x24xf32>
    %cst = arith.constant dense<0.000000e+00> : vector<32x24xf32>
    %8 = tpu.matmul %5, %7, %cst {dimension_numbers = #tpu.dot_dimension_numbers<[1], [0], [0], [1], [0, 0, 1, 1], [], []>} : vector<32x50xf32>, vector<50x24xf32>, vector<32x24xf32> -> vector<32x24xf32>
    %c0_4 = arith.constant 0 : index
    %c1 = arith.constant 1 : index
    %9 = vector.load %arg0[%c0_4, %c1] : memref<32x5xi32, #tpu.memory_space<vmem>>, vector<32x1xi32>
    %10 = vector.broadcast %9 : vector<32x1xi32> to vector<32x50xi32>
    %11 = arith.cmpi eq, %0, %10 : vector<32x50xi32>
    %12 = arith.extui %11 : vector<32x50xi1> to vector<32x50xi32>
    %13 = arith.sitofp %12 : vector<32x50xi32> to vector<32x50xf32>
    %c1_5 = arith.constant 1 : index
    %c0_6 = arith.constant 0 : index
    %c0_7 = arith.constant 0 : index
    %14 = vector.load %arg1[%c1_5, %c0_6, %c0_7] : memref<5x50x24xf32, #tpu.memory_space<vmem>>, vector<1x50x24xf32>
    %15 = vector.shape_cast %14 : vector<1x50x24xf32> to vector<50x24xf32>
    %cst_8 = arith.constant dense<0.000000e+00> : vector<32x24xf32>
    %16 = tpu.matmul %13, %15, %cst_8 {dimension_numbers = #tpu.dot_dimension_numbers<[1], [0], [0], [1], [0, 0, 1, 1], [], []>} : vector<32x50xf32>, vector<50x24xf32>, vector<32x24xf32> -> vector<32x24xf32>
    %17 = arith.addf %8, %16 : vector<32x24xf32>
    %c0_9 = arith.constant 0 : index
    %c2 = arith.constant 2 : index
    %18 = vector.load %arg0[%c0_9, %c2] : memref<32x5xi32, #tpu.memory_space<vmem>>, vector<32x1xi32>
    %19 = vector.broadcast %18 : vector<32x1xi32> to vector<32x50xi32>
    %20 = arith.cmpi eq, %0, %19 : vector<32x50xi32>
    %21 = arith.extui %20 : vector<32x50xi1> to vector<32x50xi32>
    %22 = arith.sitofp %21 : vector<32x50xi32> to vector<32x50xf32>
    %c2_10 = arith.constant 2 : index
    %c0_11 = arith.constant 0 : index
    %c0_12 = arith.constant 0 : index
    %23 = vector.load %arg1[%c2_10, %c0_11, %c0_12] : memref<5x50x24xf32, #tpu.memory_space<vmem>>, vector<1x50x24xf32>
    %24 = vector.shape_cast %23 : vector<1x50x24xf32> to vector<50x24xf32>
    %cst_13 = arith.constant dense<0.000000e+00> : vector<32x24xf32>
    %25 = tpu.matmul %22, %24, %cst_13 {dimension_numbers = #tpu.dot_dimension_numbers<[1], [0], [0], [1], [0, 0, 1, 1], [], []>} : vector<32x50xf32>, vector<50x24xf32>, vector<32x24xf32> -> vector<32x24xf32>
    %26 = arith.addf %17, %25 : vector<32x24xf32>
    %c0_14 = arith.constant 0 : index
    %c3 = arith.constant 3 : index
    %27 = vector.load %arg0[%c0_14, %c3] : memref<32x5xi32, #tpu.memory_space<vmem>>, vector<32x1xi32>
    %28 = vector.broadcast %27 : vector<32x1xi32> to vector<32x50xi32>
    %29 = arith.cmpi eq, %0, %28 : vector<32x50xi32>
    %30 = arith.extui %29 : vector<32x50xi1> to vector<32x50xi32>
    %31 = arith.sitofp %30 : vector<32x50xi32> to vector<32x50xf32>
    %c3_15 = arith.constant 3 : index
    %c0_16 = arith.constant 0 : index
    %c0_17 = arith.constant 0 : index
    %32 = vector.load %arg1[%c3_15, %c0_16, %c0_17] : memref<5x50x24xf32, #tpu.memory_space<vmem>>, vector<1x50x24xf32>
    %33 = vector.shape_cast %32 : vector<1x50x24xf32> to vector<50x24xf32>
    %cst_18 = arith.constant dense<0.000000e+00> : vector<32x24xf32>
    %34 = tpu.matmul %31, %33, %cst_18 {dimension_numbers = #tpu.dot_dimension_numbers<[1], [0], [0], [1], [0, 0, 1, 1], [], []>} : vector<32x50xf32>, vector<50x24xf32>, vector<32x24xf32> -> vector<32x24xf32>
    %35 = arith.addf %26, %34 : vector<32x24xf32>
    %c0_19 = arith.constant 0 : index
    %c4 = arith.constant 4 : index
    %36 = vector.load %arg0[%c0_19, %c4] : memref<32x5xi32, #tpu.memory_space<vmem>>, vector<32x1xi32>
    %37 = vector.broadcast %36 : vector<32x1xi32> to vector<32x50xi32>
    %38 = arith.cmpi eq, %0, %37 : vector<32x50xi32>
    %39 = arith.extui %38 : vector<32x50xi1> to vector<32x50xi32>
    %40 = arith.sitofp %39 : vector<32x50xi32> to vector<32x50xf32>
    %c4_20 = arith.constant 4 : index
    %c0_21 = arith.constant 0 : index
    %c0_22 = arith.constant 0 : index
    %41 = vector.load %arg1[%c4_20, %c0_21, %c0_22] : memref<5x50x24xf32, #tpu.memory_space<vmem>>, vector<1x50x24xf32>
    %42 = vector.shape_cast %41 : vector<1x50x24xf32> to vector<50x24xf32>
    %cst_23 = arith.constant dense<0.000000e+00> : vector<32x24xf32>
    %43 = tpu.matmul %40, %42, %cst_23 {dimension_numbers = #tpu.dot_dimension_numbers<[1], [0], [0], [1], [0, 0, 1, 1], [], []>} : vector<32x50xf32>, vector<50x24xf32>, vector<32x24xf32> -> vector<32x24xf32>
    %44 = arith.addf %35, %43 : vector<32x24xf32>
    %c0_24 = arith.constant 0 : index
    %c0_25 = arith.constant 0 : index
    %45 = vector.load %arg2[%c0_24, %c0_25] : memref<64x128xf32, #tpu.memory_space<vmem>>, vector<1x24xf32>
    %c32 = arith.constant 32 : index
    %c0_26 = arith.constant 0 : index
    %46 = vector.load %arg2[%c32, %c0_26] : memref<64x128xf32, #tpu.memory_space<vmem>>, vector<32x24xf32>
    %47 = vector.broadcast %45 : vector<1x24xf32> to vector<32x24xf32>
    %48 = arith.addf %44, %47 : vector<32x24xf32>
    %cst_27 = arith.constant 0.000000e+00 : f32
    %49 = vector.broadcast %cst_27 : f32 to vector<32x24xf32>
    %50 = arith.maximumf %48, %49 : vector<32x24xf32>
    %51 = arith.mulf %50, %46 : vector<32x24xf32>
    %52 = vector.shape_cast %51 : vector<32x24xf32> to vector<2x16x24xf32>
    %cst_28 = arith.constant dense<0xFF800000> : vector<2x24xf32>
    %53 = vector.multi_reduction <maximumf>, %52, %cst_28 [1] : vector<2x16x24xf32> to vector<2x24xf32>
    %c8 = arith.constant 8 : index
    %c0_29 = arith.constant 0 : index
    %54 = vector.load %arg2[%c8, %c0_29] : memref<64x128xf32, #tpu.memory_space<vmem>>, vector<24x4xf32>
    %c1_30 = arith.constant 1 : index
    %c0_31 = arith.constant 0 : index
    %55 = vector.load %arg2[%c1_30, %c0_31] : memref<64x128xf32, #tpu.memory_space<vmem>>, vector<1x4xf32>
    %cst_32 = arith.constant dense<0.000000e+00> : vector<2x4xf32>
    %56 = tpu.matmul %53, %54, %cst_32 {dimension_numbers = #tpu.dot_dimension_numbers<[1], [0], [0], [1], [0, 0, 1, 1], [], []>} : vector<2x24xf32>, vector<24x4xf32>, vector<2x4xf32> -> vector<2x4xf32>
    %57 = vector.broadcast %55 : vector<1x4xf32> to vector<2x4xf32>
    %58 = arith.addf %56, %57 : vector<2x4xf32>
    %cst_33 = arith.constant dense<0xFF800000> : vector<2xf32>
    %59 = vector.multi_reduction <maximumf>, %58, %cst_33 [1] : vector<2x4xf32> to vector<2xf32>
    %60 = vector.shape_cast %59 : vector<2xf32> to vector<2x1xf32>
    %61 = vector.broadcast %60 : vector<2x1xf32> to vector<2x4xf32>
    %62 = arith.subf %58, %61 : vector<2x4xf32>
    %63 = math.exp %62 : vector<2x4xf32>
    %cst_34 = arith.constant dense<0.000000e+00> : vector<2xf32>
    %64 = vector.multi_reduction <add>, %63, %cst_34 [1] : vector<2x4xf32> to vector<2xf32>
    %65 = vector.shape_cast %64 : vector<2xf32> to vector<2x1xf32>
    %66 = math.log %65 : vector<2x1xf32>
    %67 = vector.broadcast %66 : vector<2x1xf32> to vector<2x4xf32>
    %68 = arith.subf %62, %67 : vector<2x4xf32>
    %c0_35 = arith.constant 0 : index
    %c0_36 = arith.constant 0 : index
    %69 = vector.load %arg3[%c0_35, %c0_36] : memref<2x4xf32, #tpu.memory_space<vmem>>, vector<2x4xf32>
    tpu.vector_store %arg3[%c0_35, %c0_36], %68 {strides = array<i32>} : memref<2x4xf32, #tpu.memory_space<vmem>>, vector<2x4xf32>,
    return
  }
}

</mosaic_0001>

<bundles_post_ra>
// kernel: textcnn_forward.1
= control target key start
LH: loop header
LB: loop body
LE: loop exit
PB: predicated region body
PF: predicated region fallthrough
CT: control target
= control target key end

     0   :  { %v1138_v2 = vmov 1   ;;  %vm97_vm0 = vcmask 1041408   ;;  %s1429_s0 = inlined_call_operand.vmem [shape: s32[32,5], index: 0, kind: input, shape index: {}]   ;;  %s1430_s1 = inlined_call_operand.vmem [shape: f32[5,50,24], index: 1, kind: input, shape index: {}]   ;;  %s1431_s2 = inlined_call_operand.vmem [shape: f32[64,128], index: 2, kind: input, shape index: {}]   ;;  %s1432_s3 = inlined_call_operand.hbm [shape: f32[2,4], index: 3, kind: output, shape index: {}]  }
   0x1   :  { %v1169_v0 = vld [vmem:[%s1429_s0 + $0x10] sm:$0xff]  ;;  %v1174_v1 = vld [vmem:[%s1429_s0] sm:$0xff]  ;;  %1099 = vset.pattern.permute.xlu1 %v1138_v2  ;;  %1098 = vset.pattern.permute.xlu0 %v1138_v2  ;;  %v860_v3 = vld [vmem:[%s1430_s1 + $0x68] sm:$0x3] }
   0x2   :  { %59 = vperm.xlu1 %1099, %v1169_v0   ;;  %53 = vperm.xlu0 %1098, %v1174_v1   ;;  %v859_v4 = vld [vmem:[%s1430_s1 + $0x60] sm:$0xff]  ;;  %v1187_v5 = vld [vmem:[%s1429_s0 + $0x18] sm:$0xff]  ;;  %v1192_v6 = vld [vmem:[%s1429_s0 + $0x8] sm:$0xff] }
   0x3   :  { %981 = vmatprep.subr.msk.mxu0 %vm97_vm0, %v860_v3  ;;  %v51_v7 = vld [vmem:[%s1430_s1 + $0x30] sm:$0x3]  ;;  %v50_v8 = vld [vmem:[%s1430_s1 + $0x28] sm:$0xff]  ;;  %v858_v9 = vld [vmem:[%s1430_s1 + $0x58] sm:$0xff] }
   0x4   :  { %982 = vmatpush3.msk.msra.mxu0 %vm97_vm0, %v860_v3  ;;  %1001 = vmatprep.subr.msk.mxu1 %vm97_vm0, %v51_v7  ;;  %v49_v10 = vld [vmem:[%s1430_s1 + $0x20] sm:$0xff] }
   0x5   :  { %983 = vmatprep.subr.mxu0 %v859_v4  ;;  %1002 = vmatpush3.msk.msra.mxu1 %vm97_vm0, %v51_v7 }
   0x6   :  { %62 = vperm.xlu1 %1099, %v1187_v5   ;;  %56 = vperm.xlu0 %1098, %v1192_v6  }
   0x7   :  { %8 = vsyncpa [#allocation3], 0  ;;  %984 = vmatpush3.msra.mxu0 %v859_v4  ;;  %1003 = vmatprep.subr.mxu1 %v50_v8  ;;  %v857_v11 = vld [vmem:[%s1430_s1 + $0x50] sm:$0xff]  ;;  %v1139_v12 = vmov 0   ;;  %v48_v13 = vld [vmem:[%s1430_s1 + $0x18] sm:$0xff]  ;;  %v1140_v16 = vmov 2   ;;  %v15_v25 = vlaneseq }
   0x8   :  { %985 = vmatprep.subr.mxu0 %v858_v9  ;;  %1004 = vmatpush3.msra.mxu1 %v50_v8  ;;  %v856_v14 = vld [vmem:[%s1430_s1 + $0x48] sm:$0xff]  ;;  %v47_v15 = vld [vmem:[%s1430_s1 + $0x10] sm:$0xff]  ;;  %v855_v17 = vld [vmem:[%s1430_s1 + $0x40] sm:$0xff]  ;;  %v1141_v23 = vmov 3   ;;  %v1142_v24 = vmov 4   ;;  %vm84_vm1 = vcmask 408576  }
   0x9   :  { %986 = vmatpush3.msra.mxu0 %v858_v9  ;;  %1005 = vmatprep.subr.mxu1 %v49_v10  ;;  %v46_v18 = vld [vmem:[%s1430_s1 + $0x8] sm:$0xff]  ;;  %v854_v19 = vld [vmem:[%s1430_s1 + $0x38] sm:$0xff]  ;;  %v881_v20 = vld [vmem:[%s1430_s1 + $0xa0] sm:$0x3]  ;;  %v1263_v26 = vand.u32 127, %v15_v25  ;;  %v1143_v29 = vmov 0.0  }
   0xa   :  { %1101 = vset.pattern.permute.xlu1 %v1139_v12  ;;  %1100 = vset.pattern.permute.xlu0 %v1139_v12  ;;  %v45_v21 = vld [vmem:[%s1430_s1] sm:$0xff]  ;;  %v1249_v22 = vld [vmem:[%s1430_s1 + $0xd8] sm:$0x3]  ;;  %v879_v36 = vld [vmem:[%s1430_s1 + $0x90] sm:$0xff]  ;;  %s1145_s23 = smov [#allocation2]  }
   0xb   :  { %25 = vperm.xlu1 %1101, %v1192_v6   ;;  %22 = vperm.xlu0 %1100, %v1174_v1   ;;  %v880_v34 = vld [vmem:[%s1430_s1 + $0x98] sm:$0xff]  ;;  %v878_v40 = vld [vmem:[%s1430_s1 + $0x88] sm:$0xff]  ;;  %v877_v43 = vld [vmem:[%s1430_s1 + $0x80] sm:$0xff] }
   0xc   :  { %987 = vmatprep.subr.mxu0 %v857_v11  ;;  %1006 = vmatpush3.msra.mxu1 %v49_v10  ;;  %v896_v44 = vld [vmem:[%s1430_s1 + $0xd0] sm:$0xff]  ;;  %v876_v46 = vld [vmem:[%s1430_s1 + $0x78] sm:$0xff]  ;;  %v895_v48 = vld [vmem:[%s1430_s1 + $0xc8] sm:$0xff] }
   0xd   :  { %988 = vmatpush3.msra.mxu0 %v857_v11  ;;  %1007 = vmatprep.subr.mxu1 %v48_v13  ;;  %v875_v50 = vld [vmem:[%s1430_s1 + $0x70] sm:$0xff]  ;;  %v894_v51 = vld [vmem:[%s1430_s1 + $0xc0] sm:$0xff]  ;;  %v893_v58 = vld [vmem:[%s1430_s1 + $0xb8] sm:$0xff] }
   0xe   :  { %989 = vmatprep.subr.mxu0 %v856_v14  ;;  %1008 = vmatpush3.msra.mxu1 %v48_v13  ;;  %v913_v54 = vld [vmem:[%s1430_s1 + $0x110] sm:$0x3]  ;;  %v912_v59 = vld [vmem:[%s1430_s1 + $0x108] sm:$0xff]  ;;  %v911_v63 = vld [vmem:[%s1430_s1 + $0x100] sm:$0xff] }
   0xf   :  { %1102 = vset.pattern.permute.xlu1 %v1140_v16  ;;  %1103 = vset.pattern.permute.xlu0 %v1140_v16  ;;  %v892_v62 = vld [vmem:[%s1430_s1 + $0xb0] sm:$0xff]  ;;  %v910_v2 = vld [vmem:[%s1430_s1 + $0xf8] sm:$0xff]  ;;  %v908_v7 = vld [vmem:[%s1430_s1 + $0xe8] sm:$0xff] }
  0x10   :  { %287 = vperm.xlu1 %1102, %v1174_v1   ;;  %290 = vperm.xlu0 %1103, %v1192_v6   ;;  %v907_v9 = vld [vmem:[%s1430_s1 + $0xe0] sm:$0xff]  ;;  %v734_v25 = vld [vmem:[%s1431_s2 + $0x8] sm:$0xff] }
  0x11   :  { %990 = vmatpush3.msra.mxu0 %v856_v14  ;;  %1009 = vmatprep.subr.mxu1 %v47_v15 }
  0x12   :  { %991 = vmatprep.subr.mxu0 %v855_v17  ;;  %1010 = vmatpush3.msra.mxu1 %v47_v15 }
  0x13   :  { %992 = vmatpush3.msra.mxu0 %v855_v17  ;;  %1011 = vmatprep.subr.mxu1 %v46_v18 }
  0x14   :  { %1104 = vset.pattern.permute.xlu1 %v1139_v12  ;;  %293 = vperm.xlu0 %1103, %v1169_v0  }
  0x15   :  { %28 = vperm.xlu1 %1104, %v1169_v0   ;;  %993 = vmatprep.subr.mxu0 %v854_v19 }
  0x16   :  { %994 = vmatpush3.msra.mxu0 %v854_v19  ;;  %1012 = vmatpush3.msra.mxu1 %v46_v18 }
  0x17   :  { %1021 = vmatprep.subr.msk.mxu0 %vm97_vm0, %v881_v20  ;;  %1013 = vmatprep.subr.mxu1 %v45_v21 }
  0x18   :  { %1106 = vset.pattern.permute.xlu0 %v1141_v23  ;;  %1014 = vmatpush3.msra.mxu1 %v45_v21 }
  0x19   :  { %31 = vperm.xlu1 %1104, %v1187_v5   ;;  %423 = vperm.xlu0 %1106, %v1174_v1  }
  0x1a   :  { %1041 = vmatprep.subr.msk.mxu1 %vm97_vm0, %v1249_v22 }
  0x1d   :  { %1105 = vset.pattern.permute.xlu1 %v1140_v16  ;;  %1109 = vset.pattern.permute.xlu0 %v1142_v24 }
  0x1e   :  { %296 = vperm.xlu1 %1105, %v1187_v5   ;;  %562 = vperm.xlu0 %1109, %v1192_v6  }
  0x22   :  { %1107 = vset.pattern.permute.xlu1 %v1141_v23  ;;  %565 = vperm.xlu0 %1109, %v1169_v0  }
  0x23   :  { %426 = vperm.xlu1 %1107, %v1192_v6  }
  0x27   :  { %1108 = vset.pattern.permute.xlu1 %v1142_v24 }
  0x28   :  { %559 = vperm.xlu1 %1108, %v1174_v1   ;;  %v891_v1 = vld [vmem:[%s1430_s1 + $0xa8] sm:$0xff] }
  0x2c   :  { %1110 = vset.pattern.permute.xlu1 %v1141_v23  ;;  %v736_v23 = vld [vmem:[%s1431_s2 + $0x18] sm:$0xff] }
  0x2d   :  { %429 = vperm.xlu1 %1110, %v1169_v0  }
  0x31   :  { %432 = vperm.xlu1 %1110, %v1187_v5  }
  0x35   :  { %1111 = vset.pattern.permute.xlu1 %v1142_v24  ;;  %v735_v24 = vld [vmem:[%s1431_s2 + $0x10] sm:$0xff] }
  0x36   :  { %568 = vperm.xlu1 %1111, %v1187_v5   ;;  %v909_v5 = vld [vmem:[%s1430_s1 + $0xf0] sm:$0xff] }
  0x7d   :  { %v60_v27 = vpop.permute.xlu1 %59  ;;  %v54_v28 = vpop.permute.xlu0 %53 }
  0x7e   :  { %vm64_vm2 = vcmp.eq.s32.totalorder %v1263_v26, %v54_v28  ;;  %vm66_vm3 = vcmp.eq.s32.totalorder %v1263_v26, %v60_v27 }
  0x7f   :  { %v850_v30 = vsel %vm64_vm2, 1.0, %v1143_v29  ;;  %v852_v35 = vsel %vm66_vm3, 1.0, %v1143_v29 }
  0x80   :  { %995 = vmatprep.mubr.msk.f32.mxu0 %vm84_vm1, %v850_v30 }
  0x81   :  { %v63_v31 = vpop.permute.xlu1 %62  ;;  %v57_v32 = vpop.permute.xlu0 %56 }
  0x82   :  { %vm65_vm4 = vcmp.eq.s32.totalorder %v1263_v26, %v57_v32  ;;  %vm67_vm5 = vcmp.eq.s32.totalorder %v1263_v26, %v63_v31 }
  0x83   :  { %v851_v33 = vsel %vm65_vm4, 1.0, %v1143_v29  ;;  %v853_v39 = vsel %vm67_vm5, 1.0, %v1143_v29 }
  0x84   :  { %996 = vmatmul.mubr.msk.f32.vlgmr.msra.gmra.mxu0 %vm84_vm1, %v851_v33 }
  0x85   :  { %1022 = vmatpush3.msk.msra.mxu0 %vm97_vm0, %v881_v20  ;;  %998 = vmatprep.mubr.msk.f32.mxu0 %vm84_vm1, %v852_v35 }
  0x86   :  { %1023 = vmatprep.subr.mxu0 %v880_v34  ;;  %v26_v37 = vpop.permute.xlu1 %25  ;;  %v23_v38 = vpop.permute.xlu0 %22 }
  0x87   :  { %vm34_vm6 = vcmp.eq.s32.totalorder %v1263_v26, %v26_v37  ;;  %vm33_vm7 = vcmp.eq.s32.totalorder %v1263_v26, %v23_v38  ;;  %1024 = vmatpush3.msra.mxu0 %v880_v34 }
  0x88   :  { %v847_v41 = vsel %vm34_vm6, 1.0, %v1143_v29  ;;  %1025 = vmatprep.subr.mxu0 %v879_v36  ;;  %999 = vmatmul.mubr.msk.f32.gmra.mxu0 %vm84_vm1, %v853_v39  ;;  %v846_v42 = vsel %vm33_vm7, 1.0, %v1143_v29  ;;  %vm1144_vm7 = vmmov 0  }
  0x89   :  { %1026 = vmatpush3.msra.mxu0 %v879_v36  ;;  %1015 = vmatprep.mubr.msk.f32.mxu1 %vm84_vm1, %v846_v42 }
  0x8a   :  { %1027 = vmatprep.subr.mxu0 %v878_v40  ;;  %1016 = vmatmul.mubr.msk.f32.vlgmr.msra.gmra.mxu1 %vm84_vm1, %v847_v41 }
  0x8b   :  { %1028 = vmatpush3.msra.mxu0 %v878_v40  ;;  %v288_v45 = vpop.permute.xlu1 %287  ;;  %v291_v47 = vpop.permute.xlu0 %290  ;;  %1042 = vmatpush3.msk.msra.mxu1 %vm97_vm0, %v1249_v22 }
  0x8c   :  { %vm298_vm8 = vcmp.eq.s32.totalorder %v1263_v26, %v288_v45  ;;  %1029 = vmatprep.subr.mxu0 %v877_v43  ;;  %vm299_vm9 = vcmp.eq.s32.totalorder %v1263_v26, %v291_v47  ;;  %1043 = vmatprep.subr.mxu1 %v896_v44 }
  0x8d   :  { %v871_v49 = vsel %vm298_vm8, 1.0, %v1143_v29  ;;  %1030 = vmatpush3.msra.mxu0 %v877_v43  ;;  %1044 = vmatpush3.msra.mxu1 %v896_v44  ;;  %v872_v52 = vsel %vm299_vm9, 1.0, %v1143_v29  ;;  %vm744_vm8 = vcmask 1041409   ;;  %vm818_vm9 = vcmask 25600  }
  0x8e   :  { %1031 = vmatprep.subr.mxu0 %v876_v46  ;;  %1035 = vmatprep.mubr.msk.f32.mxu0 %vm84_vm1, %v871_v49 }
  0x8f   :  { %1032 = vmatpush3.msra.mxu0 %v876_v46  ;;  %1045 = vmatprep.subr.mxu1 %v895_v48  ;;  %v294_v53 = vpop.permute.xlu0 %293  ;;  %v919_v46 = vld [vmem:[%s1431_s2] ss:$0 sm:$0xff] }
  0x90   :  { %1033 = vmatprep.subr.mxu0 %v875_v50  ;;  %v29_v55 = vpop.permute.xlu1 %28  ;;  %vm300_vm10 = vcmp.eq.s32.totalorder %v1263_v26, %v294_v53  ;;  %1046 = vmatpush3.msra.mxu1 %v895_v48 }
  0x91   :  { %vm35_vm11 = vcmp.eq.s32.totalorder %v1263_v26, %v29_v55  ;;  %1034 = vmatpush3.msra.mxu0 %v875_v50  ;;  %v873_v56 = vsel %vm300_vm10, 1.0, %v1143_v29  ;;  %1047 = vmatprep.subr.mxu1 %v894_v51  ;;  %v695_v55 = vld [vmem:[%s1431_s2 + $0x20] sm:$0xff] }
  0x92   :  { %v848_v57 = vsel %vm35_vm11, 1.0, %v1143_v29  ;;  %1036 = vmatmul.mubr.msk.f32.vlgmr.msra.gmra.mxu0 %vm84_vm1, %v872_v52  ;;  %1061 = vmatprep.subr.msk.mxu0 %vm97_vm0, %v913_v54  ;;  %v696_v52 = vld [vmem:[%s1431_s2 + $0x28] sm:$0xff] }
  0x93   :  { %1018 = vmatprep.mubr.msk.f32.mxu1 %vm84_vm1, %v848_v57  ;;  %1048 = vmatpush3.msra.mxu1 %v894_v51 }
  0x94   :  { %v32_v60 = vpop.permute.xlu1 %31  ;;  %1062 = vmatpush3.msk.msra.mxu0 %vm97_vm0, %v913_v54  ;;  %1038 = vmatprep.mubr.msk.f32.mxu0 %vm84_vm1, %v873_v56  ;;  %v424_v61 = vpop.permute.xlu0 %423 }
  0x95   :  { %vm36_vm12 = vcmp.eq.s32.totalorder %v1263_v26, %v32_v60  ;;  %1049 = vmatprep.subr.mxu1 %v893_v58  ;;  %1063 = vmatprep.subr.mxu0 %v912_v59  ;;  %vm434_vm13 = vcmp.eq.s32.totalorder %v1263_v26, %v424_v61 }
  0x96   :  { %v849_v0 = vsel %vm36_vm12, 1.0, %v1143_v29  ;;  %1050 = vmatpush3.msra.mxu1 %v893_v58  ;;  %1064 = vmatpush3.msra.mxu0 %v912_v59  ;;  %v887_v3 = vsel %vm434_vm13, 1.0, %v1143_v29 }
  0x97   :  { %1019 = vmatmul.mubr.msk.f32.gmra.mxu1 %vm84_vm1, %v849_v0  ;;  %1051 = vmatprep.subr.mxu1 %v892_v62 }
  0x98   :  { %1065 = vmatprep.subr.mxu0 %v911_v63  ;;  %1052 = vmatpush3.msra.mxu1 %v892_v62 }
  0x99   :  { %v297_v4 = vpop.permute.xlu1 %296  ;;  %1066 = vmatpush3.msra.mxu0 %v911_v63  ;;  %1053 = vmatprep.subr.mxu1 %v891_v1  ;;  %v563_v8 = vpop.permute.xlu0 %562 }
  0x9a   :  { %vm301_vm14 = vcmp.eq.s32.totalorder %v1263_v26, %v297_v4  ;;  %1067 = vmatprep.subr.mxu0 %v910_v2  ;;  %1054 = vmatpush3.msra.mxu1 %v891_v1  ;;  %vm571_vm0 = vcmp.eq.s32.totalorder %v1263_v26, %v563_v8 }
  0x9b   :  { %v874_v6 = vsel %vm301_vm14, 1.0, %v1143_v29  ;;  %1055 = vmatprep.mubr.msk.f32.mxu1 %vm84_vm1, %v887_v3  ;;  %1068 = vmatpush3.msra.mxu0 %v910_v2  ;;  %v904_v14 = vsel %vm571_vm0, 1.0, %v1143_v29 }
  0x9c   :  { %1039 = vmatmul.mubr.msk.f32.gmra.mxu0 %vm84_vm1, %v874_v6  ;;  %1069 = vmatprep.subr.mxu0 %v909_v5 }
  0x9d   :  { %1070 = vmatpush3.msra.mxu0 %v909_v5  ;;  %1081 = vmatprep.subr.mxu1 %v1143_v29  ;;  %v566_v11 = vpop.permute.xlu0 %565 }
  0x9e   :  { %v427_v10 = vpop.permute.xlu1 %426  ;;  %1071 = vmatprep.subr.mxu0 %v908_v7  ;;  %vm572_vm2 = vcmp.eq.s32.totalorder %v1263_v26, %v566_v11 }
  0x9f   :  { %vm435_vm15 = vcmp.eq.s32.totalorder %v1263_v26, %v427_v10  ;;  %1072 = vmatpush3.msra.mxu0 %v908_v7  ;;  %v905_v16 = vsel %vm572_vm2, 1.0, %v1143_v29 }
  0xa0   :  { %v888_v12 = vsel %vm435_vm15, 1.0, %v1143_v29  ;;  %1073 = vmatprep.subr.mxu0 %v907_v9 }
  0xa1   :  { %1056 = vmatmul.mubr.msk.f32.vlgmr.msra.gmra.mxu1 %vm84_vm1, %v888_v12  ;;  %1074 = vmatpush3.msra.mxu0 %v907_v9  ;;  %v698_v12 = vld [vmem:[%s1431_s2 + $0x38] sm:$0xff] }
  0xa2   :  { %1082 = vmatpush3.msra.mxu1 %v736_v23 }
  0xa3   :  { %v560_v13 = vpop.permute.xlu1 %559  ;;  %1083 = vmatprep.subr.mxu1 %v1143_v29 }
  0xa4   :  { %vm570_vm3 = vcmp.eq.s32.totalorder %v1263_v26, %v560_v13  ;;  %1084 = vmatpush3.msra.mxu1 %v735_v24 }
  0xa5   :  { %v903_v15 = vsel %vm570_vm3, 1.0, %v1143_v29  ;;  %1085 = vmatprep.subr.mxu1 %v1143_v29 }
  0xa6   :  { %1075 = vmatprep.mubr.msk.f32.mxu0 %vm84_vm1, %v903_v15  ;;  %1086 = vmatpush3.msra.mxu1 %v734_v25  ;;  %v697_v15 = vld [vmem:[%s1431_s2 + $0x30] sm:$0xff] }
  0xa7   :  { %1076 = vmatmul.mubr.msk.f32.vlgmr.msra.gmra.mxu0 %vm84_vm1, %v904_v14 }
  0xa8   :  { %v430_v17 = vpop.permute.xlu1 %429  ;;  %1078 = vmatprep.mubr.msk.f32.mxu0 %vm84_vm1, %v905_v16 }
  0xa9   :  { %vm436_vm4 = vcmp.eq.s32.totalorder %v1263_v26, %v430_v17 }
  0xaa   :  { %v889_v18 = vsel %vm436_vm4, 1.0, %v1143_v29 }
  0xab   :  { %1058 = vmatprep.mubr.msk.f32.mxu1 %vm84_vm1, %v889_v18 }
  0xac   :  { %v433_v19 = vpop.permute.xlu1 %432 }
  0xad   :  { %vm437_vm5 = vcmp.eq.s32.totalorder %v1263_v26, %v433_v19 }
  0xae   :  { %v890_v20 = vsel %vm437_vm5, 1.0, %v1143_v29 }
  0xaf   :  { %1059 = vmatmul.mubr.msk.f32.gmra.mxu1 %vm84_vm1, %v890_v20 }
  0xb0   :  { %1087 = vmatprep.mubr.msk.f32.mxu1 %vm1144_vm7, %v1143_v29 }
  0xb1   :  { %v569_v21 = vpop.permute.xlu1 %568 }
  0xb2   :  { %vm573_vm6 = vcmp.eq.s32.totalorder %v1263_v26, %v569_v21 }
  0xb3   :  { %v906_v22 = vsel %vm573_vm6, 1.0, %v1143_v29 }
  0xb4   :  { %1079 = vmatmul.mubr.msk.f32.gmra.mxu0 %vm84_vm1, %v906_v22  ;;  %vm715_vm1 = vcmask 195584  }
 0x144   :  { %v997_v26 = vpop.f32.mrf.mxu0 }
 0x146   :  { %v167_v27 = vpop.f32.mrf.mxu0 }
 0x148   :  { %v1000_v28 = vpop.f32.mrf.mxu0 }
 0x14a   :  { %v1017_v30 = vpop.f32.mrf.mxu1  ;;  %v177_v31 = vpop.f32.mrf.mxu0 }
 0x14b   :  { %v273_v39 = vadd.f32 %v1017_v30, %v997_v26 }
 0x14c   :  { %v267_v32 = vpop.f32.mrf.mxu1 }
 0x14d   :  { %v268_v40 = vadd.f32 %v267_v32, %v167_v27 }
 0x152   :  { %v1037_v33 = vpop.f32.mrf.mxu0 }
 0x153   :  { %v419_v41 = vadd.f32 %v1037_v33, %v273_v39 }
 0x154   :  { %v399_v35 = vpop.f32.mrf.mxu0 }
 0x155   :  { %v418_v44 = vadd.f32 %v399_v35, %v268_v40  ;;  %v920_v35 = vld [vmem:[%s1431_s2 + $0x1] ss:$0 sm:$0xff]  ;;  %s838_s2 = sshll.u32 %s1145_s23, 4  ;;  %s839_s2 = int_to_ptr.vmem [resolvable:$true] %s838_s2 }
 0x156   :  { %s1116_s24 = scalar_lea.vmem %s839_s2, 32  ;;  %p1121_p1 = scmp.lt.s32.totalorder %s839_s2, %s839_s2 }
 0x157   :  { %v1020_v34 = vpop.f32.mrf.mxu1  ;;  %p1117_p0 = scmp.ne.s32.totalorder %s839_s2, %s1116_s24  ;;  %p1122_p2 = scmp.lt.s32.totalorder %s1116_s24, %s1116_s24 }
 0x158   :  { %v283_v57 = vadd.f32 %v1020_v34, %v1000_v28 }
 0x159   :  { %v277_v36 = vpop.f32.mrf.mxu1  ;;  %p1123_p3 = por %p1122_p2, %p1121_p1 }
 0x15a   :  { %v278_v61 = vadd.f32 %v277_v36, %v177_v31 }
 0x15b   :  { %p1124_p4 = pnand %p1123_p3, %p1117_p0 }
 0x15c   :  { %v1040_v37 = vpop.f32.mrf.mxu0 }
 0x15d   :  { %v421_v62 = vadd.f32 %v1040_v37, %v283_v57 }
 0x15e   :  { %v409_v42 = vpop.f32.mrf.mxu0 }
 0x15f   :  { %v420_v1 = vadd.f32 %v409_v42, %v278_v61 }
 0x161   :  { %v1057_v38 = vpop.f32.mrf.mxu1 }
 0x162   :  { %v555_v29 = vadd.f32 %v1057_v38, %v419_v41 }
 0x163   :  { %v535_v43 = vpop.f32.mrf.mxu1 }
 0x164   :  { %v554_v47 = vadd.f32 %v535_v43, %v418_v44 }
 0x167   :  { %v1077_v45 = vpop.f32.mrf.mxu0 }
 0x168   :  { %v691_v48 = vadd.f32 %v1077_v45, %v555_v29 }
 0x169   :  { %v671_v49 = vpop.f32.mrf.mxu0 }
 0x16a   :  { %v704_v50 = vadd.f32 %v919_v46, %v691_v48  ;;  %v690_v51 = vadd.f32 %v671_v49, %v554_v47 }
 0x16c   :  { %v708_v53 = vmax.f32 %v704_v50, 0.0  ;;  %v703_v54 = vadd.f32 %v919_v46, %v690_v51 }
 0x16e   :  { %v707_v56 = vmax.f32 %v703_v54, 0.0  ;;  %v712_v58 = vmul.f32 %v708_v53, %v696_v52 }
 0x16f   :  { %v1060_v59 = vpop.f32.mrf.mxu1 }
 0x170   :  { %v711_v60 = vmul.f32 %v707_v56, %v695_v55  ;;  %v717_v2 = vsel %vm715_vm1, %v712_v58, -inf  ;;  %v557_v3 = vadd.f32 %v1060_v59, %v421_v62 }
 0x171   :  { %v545_v0 = vpop.f32.mrf.mxu1 }
 0x172   :  { %v716_v63 = vsel %vm715_vm1, %v711_v60, -inf  ;;  %v556_v6 = vadd.f32 %v545_v0, %v420_v1 }
 0x173   :  { %v718_v4 = vmax.f32 %v716_v63, %v717_v2 }
 0x174   :  { %v1080_v5 = vpop.f32.mrf.mxu0 }
 0x175   :  { %v693_v7 = vadd.f32 %v1080_v5, %v557_v3  ;;  %v719_v11 = vrot.slane %v718_v4, 4 }
 0x176   :  { %v681_v8 = vpop.f32.mrf.mxu0 }
 0x177   :  { %v706_v9 = vadd.f32 %v919_v46, %v693_v7  ;;  %v692_v10 = vadd.f32 %v681_v8, %v556_v6  ;;  %v720_v18 = vmax.f32 %v718_v4, %v719_v11 }
 0x179   :  { %v710_v13 = vmax.f32 %v706_v9, 0.0  ;;  %v705_v14 = vadd.f32 %v919_v46, %v692_v10  ;;  %v721_v22 = vrot.slane %v720_v18, 2 }
 0x17b   :  { %v714_v16 = vmul.f32 %v710_v13, %v698_v12  ;;  %v709_v17 = vmax.f32 %v705_v14, 0.0  ;;  %v722_v25 = vmax.f32 %v720_v18, %v721_v22 }
 0x17d   :  { %v713_v19 = vmul.f32 %v709_v17, %v697_v15  ;;  %v726_v20 = vsel %vm715_vm1, %v714_v16, -inf  ;;  %v723_v28 = vrot.slane %v722_v25, 1 }
 0x17f   :  { %v725_v21 = vsel %vm715_vm1, %v713_v19, -inf  ;;  %v724_v32 = vmax.f32 %v722_v25, %v723_v28 }
 0x180   :  { %v727_v23 = vmax.f32 %v725_v21, %v726_v20 }
 0x182   :  { %v728_v24 = vrot.slane %v727_v23, 4 }
 0x184   :  { %v729_v26 = vmax.f32 %v727_v23, %v728_v24 }
 0x186   :  { %v730_v27 = vrot.slane %v729_v26, 2 }
 0x188   :  { %v731_v30 = vmax.f32 %v729_v26, %v730_v27 }
 0x18a   :  { %v732_v31 = vrot.slane %v731_v30, 1 }
 0x18c   :  { %v733_v33 = vmax.f32 %v731_v30, %v732_v31 }
 0x18e   :  { %v745_v34 = vsel %vm744_vm8, %v733_v33, %v724_v32 }
 0x18f   :  { %1088 = vmatmul.mubr.msk.f32.vlgmr.msra.gmra.mxu1 %vm715_vm1, %v745_v34 }
 0x24f   :  { %v814_v36 = vpop.f32.mrf.mxu1 }
 0x250   :  { %v815_v37 = vadd.f32 %v920_v35, %v814_v36 }
 0x251   :  { %v1089_v38 = vpop.f32.mrf.mxu1 }
 0x252   :  { %v819_v39 = vsel %vm818_vm9, %v815_v37, -inf }
 0x253   :  { %820 = vmax.xlane.f32.xlu0 %v819_v39 }
 0x2dc   :  { %v821_v40 = vpop.xlane.xlu0 %820 }
 0x2dd   :  { %v822_v41 = vsub.f32 %v815_v37, %v821_v40 }
 0x2df   :  { %v823_v42 = vmul.f32 1.442695, %v822_v41 }
 0x2e1   :  { %1112 = vpow2.f32 %v823_v42 }
 0x2ee   :  { %v1113_v43 = vpop.eup %1112 }
 0x2ef   :  { %v825_v44 = vsel %vm818_vm9, %v1113_v43, 0.0 }
 0x2f0   :  { %826 = vadd.xlane.f32.xlu1 %v825_v44 }
 0x379   :  { %v827_v29 = vpop.xlane.xlu1 %826 }
 0x37a   :  { %1114 = vlog2.f32 %v827_v29 }
 0x387   :  { %v1115_v45 = vpop.eup %1114 }
 0x388   :  { %v829_v46 = vmul.f32 0.6931472, %v1115_v45 }
 0x38a   :  { %v830_v47 = vsub.f32 %v822_v41, %v829_v46 }
 0x38c   :  { %831 = vst.msk [vmem:[#allocation2] sm:$0x3] %vm818_vm9, %v830_v47 }
 0x38d   :  { %1127 = shalt.err (!%p1124_p4)
}
 0x38e   :  { %841 = dma.vmem_to_hbm [thread:$0]  %s839_s2, 32, %s1432_s3, [#allocation3]  }
 0x38f   :  { %1136 = dma.done.wait [#allocation3], 32  }
 0x390   :  { %1137 = vsyncadd [#allocation3], 4294967264 }
 0x391   :  { %845 = vsyncpa [#allocation3], 1 }

</bundles_post_ra>
